<compile_context>
chip_gen: v7x
topology: tpu7x:2x2x1
jax: 0.10.0
libtpu: 0.0.40
codegen_flags: <defaults>
</compile_context>

<pallas_src>
import jax
import jax.numpy as jnp
from jax.experimental import pallas as pl
from jax.experimental.pallas import tpu as pltpu


def _cdiv(a, b):
    return -(-a // b)


def _round_up(a, m):
    return _cdiv(a, m) * m


def _pack_factor(f, n):
    """Rows-per-128-lane pack factor usable via a FREE contiguous reshape:
    f must divide 128 and the factor must divide n (no padding, no copy)."""
    if f >= 128 or 128 % f != 0:
        return 1
    p = 128 // f
    while p > 1 and n % p != 0:
        p //= 2
    return p
    # TODO(synk): feature widths not dividing 128 (e.g. 48/96) fall back to
    # <128-lane blocks; in-kernel repacking would avoid lane-padded vregs.


def _make_kernel(n_inner, tr_x, tr_y, np_x, np_y, needs_mask):
    def kernel(x_ref, y_ref, wx_ref, wy_ref, o_ref, accx_ref, accy_ref):
        o = pl.program_id(0)
        i = pl.program_id(1)

        @pl.when(i == 0)
        def _init():
            accx_ref[...] = jnp.zeros_like(accx_ref)
            accy_ref[...] = jnp.zeros_like(accy_ref)

        xv = x_ref[...].astype(jnp.float32)
        yv = y_ref[...].astype(jnp.float32)
        # sigmoid(x) = 0.5*(1+tanh(x/2)): single EUP op per vreg.
        sx = 0.5 * (1.0 + jnp.tanh(0.5 * xv))
        xw = sx * wx_ref[...]
        yw = yv * wy_ref[...]

        if needs_mask:
            # logical (unclamped) block index; rows >= N contribute nothing.
            lb = o * n_inner + i
            vx = np_x - lb * tr_x          # valid packed rows in this block
            vy = np_y - lb * tr_y          # (<= 0 -> block fully masked)
            rx = jax.lax.broadcasted_iota(jnp.int32, xw.shape, 0)
            ry = jax.lax.broadcasted_iota(jnp.int32, yw.shape, 0)
            xw = jnp.where(rx < vx, xw, 0.0)   # select: OOB garbage/NaN cannot
            yw = jnp.where(ry < vy, yw, 0.0)   # propagate into the sum

        # lane-wide accumulation: only the sublane axis is reduced per step;
        # the cross-lane reduction happens once in the finalize branch.
        accx_ref[...] += jnp.sum(xw, axis=0, keepdims=True)
        accy_ref[...] += jnp.sum(yw, axis=0, keepdims=True)

        @pl.when(i == pl.num_programs(1) - 1)
        def _finalize():
            o_ref[...] = (jnp.sum(accx_ref[...]) +
                          jnp.sum(accy_ref[...])).reshape(1, 1, 1)

    return kernel


def cost_fun_forward(x, y, w, b, *, tile_rows=8192, n_outer=1,
                     core_parallel=False):
    """Pallas forward of cost_fun: cost = sum(cat(Y, sigmoid(X), 1) @ w + b).

    x=(X,), y=(Y,) with X:[N,Fx], Y:[N,Fy]; w:[Fy+Fx,H]; b:[H].
    tile_rows     : raw rows streamed per grid step (auto-clamped to VMEM).
    n_outer       : outer grid split; keep 1 on v5e/v6e (single TensorCore),
                    use 2 on v7x (2 TCs/chip) together with core_parallel=True.
    core_parallel : emit pltpu.CORE_PARALLEL on the outer axis (v7x only).
    """
    (X,) = x
    (Y,) = y
    N, Fx = X.shape
    Ny, Fy = Y.shape
    assert Ny == N
    H = w.shape[1]
    assert w.shape[0] == Fx + Fy and b.shape == (H,)

    # --- fold the Linear + global sum into two per-feature weight vectors ---
    #   sum((Y|sig(X)) @ W + B) = sum_n Y[n]·rowsum(W[:Fy])
    #                           + sum_n sig(X[n])·rowsum(W[Fy:]) + N*sum(B)
    # (tiny; hoist out of the call for repeated invocations with fixed W, B)
    wy_sum = jnp.sum(w[:Fy, :].astype(jnp.float32), axis=1)   # (Fy,)
    wx_sum = jnp.sum(w[Fy:, :].astype(jnp.float32), axis=1)   # (Fx,)
    bias_term = jnp.float32(N) * jnp.sum(b.astype(jnp.float32))

    # --- lane packing via FREE contiguous reshape (no pad, no astype) -------
    px = _pack_factor(Fx, N)
    py = _pack_factor(Fy, N)
    Xp = X.reshape(N // px, Fx * px) if px > 1 else X
    Yp = Y.reshape(N // py, Fy * py) if py > 1 else Y
    wxv = (jnp.tile(wx_sum, px) if px > 1 else wx_sum).reshape(1, -1)
    wyv = (jnp.tile(wy_sum, py) if py > 1 else wy_sum).reshape(1, -1)
    np_x, lx = N // px, Fx * px
    np_y, ly = N // py, Fy * py

    # --- tiling: big blocks (~MiBs) to amortize the ~0.35 us/grid-step cost --
    sub_x = 8 * max(1, 4 // X.dtype.itemsize)      # sublane quantum per dtype
    sub_y = 8 * max(1, 4 // Y.dtype.itemsize)
    quantum = max(sub_x * px, sub_y * py)          # powers of two -> lcm = max
    tile_rows = max(quantum, _round_up(min(tile_rows, N), quantum))
    row_bytes = max(Fx * X.dtype.itemsize, Fy * Y.dtype.itemsize)
    cap_rows = max(quantum, (4 << 20) // max(1, row_bytes) // quantum * quantum)
    tile_rows = min(tile_rows, cap_rows)           # <= ~4 MiB per input block
    n_blocks = _cdiv(N, tile_rows)
    n_outer = max(1, min(n_outer, n_blocks))
    n_inner = _cdiv(n_blocks, n_outer)

    if n_blocks == 1:                              # full-extent block, no mask
        tr_x, tr_y = np_x, np_y
        needs_mask = False
    else:
        tr_x, tr_y = tile_rows // px, tile_rows // py
        needs_mask = (n_outer * n_inner * tile_rows) != N

    kernel = _make_kernel(n_inner, tr_x, tr_y, np_x, np_y, needs_mask)

    last = n_blocks - 1
    row_map = lambda o, i: (jnp.minimum(o * n_inner + i, last), 0)
    w_map = lambda o, i: (0, 0)

    # 2 inputs x 2 pipeline buffers + accumulators + slack
    vmem_need = 2 * (tr_x * lx * Xp.dtype.itemsize +
                     tr_y * ly * Yp.dtype.itemsize) + 8 * (lx + ly) + (2 << 20)
    vmem_limit = int(min(48 << 20, max(vmem_need, 16 << 20)))

    outer_sem = (pltpu.CORE_PARALLEL if (core_parallel and n_outer > 1)
                 else (pltpu.ARBITRARY if n_outer == 1 else pltpu.PARALLEL))

    partials = pl.pallas_call(
        kernel,
        out_shape=jax.ShapeDtypeStruct((n_outer, 1, 1), jnp.float32),
        grid_spec=pltpu.PrefetchScalarGridSpec(
            num_scalar_prefetch=0,
            grid=(n_outer, n_inner),
            in_specs=[
                pl.BlockSpec((tr_x, lx), row_map),
                pl.BlockSpec((tr_y, ly), row_map),
                pl.BlockSpec((1, lx), w_map),
                pl.BlockSpec((1, ly), w_map),
            ],
            out_specs=pl.BlockSpec((1, 1, 1), lambda o, i: (o, 0, 0)),
            scratch_shapes=[pltpu.VMEM((1, lx), jnp.float32),
                            pltpu.VMEM((1, ly), jnp.float32)],
        ),
        compiler_params=pltpu.CompilerParams(
            dimension_semantics=(outer_sem, pltpu.ARBITRARY),
            vmem_limit_bytes=vmem_limit),
        cost_estimate=pl.CostEstimate(
            flops=4 * N * (Fx + Fy),
            transcendentals=N * Fx,
            bytes_accessed=N * (Fx * X.dtype.itemsize + Fy * Y.dtype.itemsize)),
    )(Xp, Yp, wxv, wyv)

    cost = jnp.sum(partials) + bias_term
    return (cost,)


if __name__ == "__main__":
    # small shapes consistent with the forward: batch=256, Fx=Fy=32, hidden=32
    N, Fx, Fy, H = 256, 32, 32, 32

    key = jax.random.PRNGKey(0)
    kx, ky, kw, kb = jax.random.split(key, 4)

    X = jax.random.normal(kx, (N, Fx), dtype=jnp.float32)
    Y = jax.random.normal(ky, (N, Fy), dtype=jnp.float32)

    # deterministic "model" parameters (nn.Linear(Fy+Fx, H) equivalent)
    W = jax.random.normal(kw, (Fy + Fx, H), dtype=jnp.float32) * 0.05
    B = jax.random.normal(kb, (H,), dtype=jnp.float32) * 0.05

    def reference(Xr, Yr):
        Z = jnp.concatenate([Yr, jax.nn.sigmoid(Xr)], axis=1)
        return jnp.sum(Z @ W + B)

    # 1) default tiling: single full-extent lane-packed (64,128) block
    (cost,) = cost_fun_forward((X,), (Y,), W, B)
    jax.block_until_ready(cost)
    ref = reference(X, Y)
    assert jnp.allclose(cost, ref, rtol=1e-3, atol=1e-3), (cost, ref)

    # 2) multi-block + ragged tail: in-kernel masking of the partial last block
    Nr = 200
    (cost_r,) = cost_fun_forward((X[:Nr],), (Y[:Nr],), W, B,
                                 tile_rows=64, n_outer=2)
    jax.block_until_ready(cost_r)
    ref_r = reference(X[:Nr], Y[:Nr])
    assert jnp.allclose(cost_r, ref_r, rtol=1e-3, atol=1e-3), (cost_r, ref_r)

    # 3) odd batch (no lane packing) + grid over-coverage block fully masked
    No = 77
    (cost_o,) = cost_fun_forward((X[:No],), (Y[:No],), W, B,
                                 tile_rows=32, n_outer=2)
    jax.block_until_ready(cost_o)
    ref_o = reference(X[:No], Y[:No])
    assert jnp.allclose(cost_o, ref_o, rtol=1e-3, atol=1e-3), (cost_o, ref_o)

    # 4) inputs that already live in bf16 upstream (no wrapper-side astype;
    #    kernel math stays f32)
    Xb, Yb = X.astype(jnp.bfloat16), Y.astype(jnp.bfloat16)
    (cost_b,) = cost_fun_forward((Xb,), (Yb,), W, B)
    jax.block_until_ready(cost_b)
    ref_b = reference(Xb.astype(jnp.float32), Yb.astype(jnp.float32))
    assert jnp.allclose(cost_b, ref_b, rtol=2e-2, atol=2e-2), (cost_b, ref_b)

    print("KERNEL_OK")
</pallas_src>

<mosaic_0001>
module attributes {stable_mosaic.version = 11 : i64} {
  func.func @kernel(%arg0: i32, %arg1: i32, %arg2: memref<64x128xf32, #tpu.memory_space<vmem>>, %arg3: memref<64x128xf32, #tpu.memory_space<vmem>>, %arg4: memref<1x128xf32, #tpu.memory_space<vmem>>, %arg5: memref<1x128xf32, #tpu.memory_space<vmem>>, %arg6: memref<1x1x1xf32, #tpu.memory_space<vmem>>, %arg7: memref<1x128xf32, #tpu.memory_space<vmem>>, %arg8: memref<1x128xf32, #tpu.memory_space<vmem>>) attributes {dimension_semantics = [#tpu.dimension_semantics<arbitrary>, #tpu.dimension_semantics<arbitrary>], iteration_bounds = array<i64: 1, 1>, scalar_prefetch = 0 : i64, scratch_operands = 2 : i64, tpu.core_type = #tpu.core_type<tc>, window_params = [{transform_indices = @transform_0, window_bounds = array<i64: 64, 128>}, {transform_indices = @transform_1, window_bounds = array<i64: 64, 128>}, {pipeline_mode = #tpu.pipeline_mode<synchronous>, transform_indices = @transform_2, window_bounds = array<i64: 1, 128>}, {pipeline_mode = #tpu.pipeline_mode<synchronous>, transform_indices = @transform_3, window_bounds = array<i64: 1, 128>}, {transform_indices = @transform_4, window_bounds = array<i64: 1, 1, 1>}]} {
    %c0_i32 = arith.constant 0 : i32
    %0 = arith.cmpi eq, %arg1, %c0_i32 : i32
    %1 = arith.extui %0 : i1 to i32
    %c0_i32_0 = arith.constant 0 : i32
    %2 = arith.cmpi ne, %1, %c0_i32_0 : i32
    scf.if %2 {
      %cst_22 = arith.constant 0.000000e+00 : f32
      %31 = vector.broadcast %cst_22 : f32 to vector<1x128xf32>
      %c0_23 = arith.constant 0 : index
      %c0_24 = arith.constant 0 : index
      %32 = vector.load %arg7[%c0_23, %c0_24] : memref<1x128xf32, #tpu.memory_space<vmem>>, vector<1x128xf32>
      tpu.vector_store %arg7[%c0_23, %c0_24], %31 {strides = array<i32>} : memref<1x128xf32, #tpu.memory_space<vmem>>, vector<1x128xf32>,
      %cst_25 = arith.constant 0.000000e+00 : f32
      %33 = vector.broadcast %cst_25 : f32 to vector<1x128xf32>
      %c0_26 = arith.constant 0 : index
      %c0_27 = arith.constant 0 : index
      %34 = vector.load %arg8[%c0_26, %c0_27] : memref<1x128xf32, #tpu.memory_space<vmem>>, vector<1x128xf32>
      tpu.vector_store %arg8[%c0_26, %c0_27], %33 {strides = array<i32>} : memref<1x128xf32, #tpu.memory_space<vmem>>, vector<1x128xf32>,
    } else {
    }
    %c0 = arith.constant 0 : index
    %c0_1 = arith.constant 0 : index
    %3 = vector.load %arg2[%c0, %c0_1] : memref<64x128xf32, #tpu.memory_space<vmem>>, vector<64x128xf32>
    %c0_2 = arith.constant 0 : index
    %c0_3 = arith.constant 0 : index
    %4 = vector.load %arg3[%c0_2, %c0_3] : memref<64x128xf32, #tpu.memory_space<vmem>>, vector<64x128xf32>
    %cst = arith.constant 5.000000e-01 : f32
    %5 = vector.broadcast %cst : f32 to vector<64x128xf32>
    %6 = arith.mulf %5, %3 : vector<64x128xf32>
    %7 = math.tanh %6 : vector<64x128xf32>
    %cst_4 = arith.constant 1.000000e+00 : f32
    %8 = vector.broadcast %cst_4 : f32 to vector<64x128xf32>
    %9 = arith.addf %8, %7 : vector<64x128xf32>
    %cst_5 = arith.constant 5.000000e-01 : f32
    %10 = vector.broadcast %cst_5 : f32 to vector<64x128xf32>
    %11 = arith.mulf %10, %9 : vector<64x128xf32>
    %c0_6 = arith.constant 0 : index
    %c0_7 = arith.constant 0 : index
    %12 = vector.load %arg4[%c0_6, %c0_7] : memref<1x128xf32, #tpu.memory_space<vmem>>, vector<1x128xf32>
    %13 = vector.broadcast %12 : vector<1x128xf32> to vector<64x128xf32>
    %14 = arith.mulf %11, %13 : vector<64x128xf32>
    %c0_8 = arith.constant 0 : index
    %c0_9 = arith.constant 0 : index
    %15 = vector.load %arg5[%c0_8, %c0_9] : memref<1x128xf32, #tpu.memory_space<vmem>>, vector<1x128xf32>
    %16 = vector.broadcast %15 : vector<1x128xf32> to vector<64x128xf32>
    %17 = arith.mulf %4, %16 : vector<64x128xf32>
    %c0_10 = arith.constant 0 : index
    %c0_11 = arith.constant 0 : index
    %18 = vector.load %arg7[%c0_10, %c0_11] : memref<1x128xf32, #tpu.memory_space<vmem>>, vector<1x128xf32>
    %cst_12 = arith.constant dense<0.000000e+00> : vector<128xf32>
    %19 = vector.multi_reduction <add>, %14, %cst_12 [0] : vector<64x128xf32> to vector<128xf32>
    %20 = vector.shape_cast %19 : vector<128xf32> to vector<1x128xf32>
    %21 = arith.addf %18, %20 : vector<1x128xf32>
    %c0_13 = arith.constant 0 : index
    %c0_14 = arith.constant 0 : index
    %22 = vector.load %arg7[%c0_13, %c0_14] : memref<1x128xf32, #tpu.memory_space<vmem>>, vector<1x128xf32>
    tpu.vector_store %arg7[%c0_13, %c0_14], %21 {strides = array<i32>} : memref<1x128xf32, #tpu.memory_space<vmem>>, vector<1x128xf32>,
    %c0_15 = arith.constant 0 : index
    %c0_16 = arith.constant 0 : index
    %23 = vector.load %arg8[%c0_15, %c0_16] : memref<1x128xf32, #tpu.memory_space<vmem>>, vector<1x128xf32>
    %cst_17 = arith.constant dense<0.000000e+00> : vector<128xf32>
    %24 = vector.multi_reduction <add>, %17, %cst_17 [0] : vector<64x128xf32> to vector<128xf32>
    %25 = vector.shape_cast %24 : vector<128xf32> to vector<1x128xf32>
    %26 = arith.addf %23, %25 : vector<1x128xf32>
    %c0_18 = arith.constant 0 : index
    %c0_19 = arith.constant 0 : index
    %27 = vector.load %arg8[%c0_18, %c0_19] : memref<1x128xf32, #tpu.memory_space<vmem>>, vector<1x128xf32>
    tpu.vector_store %arg8[%c0_18, %c0_19], %26 {strides = array<i32>} : memref<1x128xf32, #tpu.memory_space<vmem>>, vector<1x128xf32>,
    %c0_i32_20 = arith.constant 0 : i32
    %28 = arith.cmpi eq, %arg1, %c0_i32_20 : i32
    %29 = arith.extui %28 : i1 to i32
    %c0_i32_21 = arith.constant 0 : i32
    %30 = arith.cmpi ne, %29, %c0_i32_21 : i32
    scf.if %30 {
      %c0_22 = arith.constant 0 : index
      %c0_23 = arith.constant 0 : index
      %31 = vector.load %arg7[%c0_22, %c0_23] : memref<1x128xf32, #tpu.memory_space<vmem>>, vector<1x128xf32>
      %32 = vector.shape_cast %31 : vector<1x128xf32> to vector<1x1x128xf32>
      %cst_24 = arith.constant dense<0.000000e+00> : vector<1xf32>
      %33 = vector.multi_reduction <add>, %32, %cst_24 [1, 2] : vector<1x1x128xf32> to vector<1xf32>
      %34 = vector.shape_cast %33 : vector<1xf32> to vector<1x1x1xf32>
      %35 = vector.extract %34[0, 0, 0] : f32 from vector<1x1x1xf32>
      %c0_25 = arith.constant 0 : index
      %c0_26 = arith.constant 0 : index
      %36 = vector.load %arg8[%c0_25, %c0_26] : memref<1x128xf32, #tpu.memory_space<vmem>>, vector<1x128xf32>
      %37 = vector.shape_cast %36 : vector<1x128xf32> to vector<1x1x128xf32>
      %cst_27 = arith.constant dense<0.000000e+00> : vector<1xf32>
      %38 = vector.multi_reduction <add>, %37, %cst_27 [1, 2] : vector<1x1x128xf32> to vector<1xf32>
      %39 = vector.shape_cast %38 : vector<1xf32> to vector<1x1x1xf32>
      %40 = vector.extract %39[0, 0, 0] : f32 from vector<1x1x1xf32>
      %41 = arith.addf %35, %40 : f32
      %42 = vector.broadcast %41 : f32 to vector<1x1x1xf32>
      %c0_28 = arith.constant 0 : index
      %c0_29 = arith.constant 0 : index
      %c0_30 = arith.constant 0 : index
      %43 = vector.load %arg6[%c0_28, %c0_29, %c0_30] : memref<1x1x1xf32, #tpu.memory_space<vmem>>, vector<1x1x1xf32>
      tpu.vector_store %arg6[%c0_28, %c0_29, %c0_30], %42 {strides = array<i32>} : memref<1x1x1xf32, #tpu.memory_space<vmem>>, vector<1x1x1xf32>,
    } else {
    }
    return
  }
  func.func @transform_0(%arg0: i32, %arg1: i32) -> (i32, i32) {
    %c1_i32 = arith.constant 1 : i32
    %0 = arith.muli %arg0, %c1_i32 : i32
    %1 = arith.addi %0, %arg1 : i32
    %c0_i32 = arith.constant 0 : i32
    %2 = arith.minsi %1, %c0_i32 : i32
    %c0_i32_0 = arith.constant 0 : i32
    %c0_i32_1 = arith.constant 0 : i32
    return %2, %c0_i32_0 : i32, i32
  }
  func.func @transform_1(%arg0: i32, %arg1: i32) -> (i32, i32) {
    %c1_i32 = arith.constant 1 : i32
    %0 = arith.muli %arg0, %c1_i32 : i32
    %1 = arith.addi %0, %arg1 : i32
    %c0_i32 = arith.constant 0 : i32
    %2 = arith.minsi %1, %c0_i32 : i32
    %c0_i32_0 = arith.constant 0 : i32
    %c0_i32_1 = arith.constant 0 : i32
    return %2, %c0_i32_0 : i32, i32
  }
  func.func @transform_2(%arg0: i32, %arg1: i32) -> (i32, i32) {
    %c0_i32 = arith.constant 0 : i32
    %c0_i32_0 = arith.constant 0 : i32
    %c0_i32_1 = arith.constant 0 : i32
    return %c0_i32, %c0_i32_0 : i32, i32
  }
  func.func @transform_3(%arg0: i32, %arg1: i32) -> (i32, i32) {
    %c0_i32 = arith.constant 0 : i32
    %c0_i32_0 = arith.constant 0 : i32
    %c0_i32_1 = arith.constant 0 : i32
    return %c0_i32, %c0_i32_0 : i32, i32
  }
  func.func @transform_4(%arg0: i32, %arg1: i32) -> (i32, i32, i32) {
    %c0_i32 = arith.constant 0 : i32
    %c0_i32_0 = arith.constant 0 : i32
    %c0_i32_1 = arith.constant 0 : i32
    return %arg0, %c0_i32, %c0_i32_0 : i32, i32, i32
  }
}

</mosaic_0001>

<bundles_post_ra>
// kernel: tpu_custom_call.1
= control target key start
LH: loop header
LB: loop body
LE: loop exit
PB: predicated region body
PF: predicated region fallthrough
CT: control target
= control target key end

     0   :  { %9 = vsyncpa [#allocation5], 0  ;;  %s405_s0 = inlined_call_operand.hbm [shape: f32[64,128], index: 0, kind: input, shape index: {}]   ;;  %s406_s1 = inlined_call_operand.hbm [shape: f32[64,128], index: 1, kind: input, shape index: {}]   ;;  %s407_s2 = inlined_call_operand.vmem [shape: f32[1,128], index: 2, kind: input, shape index: {}]   ;;  %s408_s3 = inlined_call_operand.vmem [shape: f32[1,128], index: 3, kind: input, shape index: {}]   ;;  %s409_s4 = inlined_call_operand.hbm [shape: f32[1,1,1], index: 4, kind: output, shape index: {}]  }
   0x1   :  { %10 = vsyncpa [#allocation8], 0 }
   0x2   :  { %11 = vsyncpa [#allocation6], 0  ;;  %s332_s15 = smov [#allocation4]   ;;  %s260_s19 = scalar_lea.hbm %s405_s0, 1024 }
   0x3   :  { %s23_s16 = sshll.u32 %s332_s15, 4  ;;  %p261_p0 = scmp.ne.s32.totalorder %s405_s0, %s260_s19  ;;  %s24_s16 = int_to_ptr.vmem [resolvable:$true] %s23_s16 }
   0x4   :  { %p264_p1 = scmp.lt.u32.totalorder %s260_s19, %s405_s0 }
   0x6   :  { %p266_p2 = pnand %p264_p1, %p261_p0 }
   0x8   :  { %269 = shalt.err (!%p266_p2)
}
   0x9   :  { %s270_s24 = scalar_lea.vmem %s24_s16, 1024  ;;  %p275_p4 = scmp.lt.s32.totalorder %s24_s16, %s24_s16 }
   0xa   :  { %p271_p3 = scmp.ne.s32.totalorder %s24_s16, %s270_s24  ;;  %p276_p5 = scmp.lt.s32.totalorder %s270_s24, %s270_s24 }
   0xc   :  { %p277_p6 = por %p276_p5, %p275_p4 }
   0xe   :  { %p278_p7 = pnand %p277_p6, %p271_p3 }
  0x10   :  { %281 = shalt.err (!%p278_p7)
}
  0x11   :  { %s333_s25 = smov 128   ;;  %s334_s26 = smov 8  }
  0x12   :  { %29 = dma.hbm_to_vmem [thread:$0]  %s405_s0, 1024, %s24_s16, [#allocation5], %s333_s25, %s333_s25, %s334_s26  }
  0x13   :  { %s335_s29 = smov [#allocation7]   ;;  %s282_s7 = scalar_lea.hbm %s406_s1, 1024 }
  0x14   :  { %s41_s30 = sshll.u32 %s335_s29, 4  ;;  %p283_p8 = scmp.ne.s32.totalorder %s406_s1, %s282_s7  ;;  %s42_s30 = int_to_ptr.vmem [resolvable:$true] %s41_s30 }
  0x15   :  { %p286_p9 = scmp.lt.u32.totalorder %s282_s7, %s406_s1 }
  0x17   :  { %p288_p10 = pnand %p286_p9, %p283_p8 }
  0x19   :  { %291 = shalt.err (!%p288_p10)
}
  0x1a   :  { %s292_s12 = scalar_lea.vmem %s42_s30, 1024  ;;  %p297_p12 = scmp.lt.s32.totalorder %s42_s30, %s42_s30 }
  0x1b   :  { %p293_p11 = scmp.ne.s32.totalorder %s42_s30, %s292_s12  ;;  %p298_p13 = scmp.lt.s32.totalorder %s292_s12, %s292_s12 }
  0x1d   :  { %p299_p0 = por %p298_p13, %p297_p12 }
  0x1f   :  { %p300_p1 = pnand %p299_p0, %p293_p11 }
  0x21   :  { %303 = shalt.err (!%p300_p1)
}
  0x22   :  { %47 = dma.hbm_to_vmem [thread:$0]  %s406_s1, 1024, %s42_s30, [#allocation8], %s333_s25, %s333_s25, %s334_s26  }
  0x23   :  { %326 = dma.done.wait [#allocation5], 1024  }
  0x24   :  { %327 = vsyncadd [#allocation5], 4294966272 }
  0x25   :  { %328 = dma.done.wait [#allocation8], 1024  }
  0x26   :  { %329 = vsyncadd [#allocation8], 4294966272  ;;  %v336_v0 = vmov 0.0   ;;  %v72_v1 = vld [vmem:[#allocation4] sm:$0xff]  ;;  %v73_v2 = vld [vmem:[#allocation4 + $0x8] sm:$0xff]  ;;  %vm186_vm0 = vcmask 1040384  }
  0x27   :  { %70 = vst [vmem:[#allocation2] sm:$0x1] %v336_v0  ;;  %71 = vst [vmem:[#allocation3] sm:$0x1] %v336_v0  ;;  %v74_v3 = vld [vmem:[#allocation4 + $0x10] sm:$0xff]  ;;  %v75_v4 = vld [vmem:[#allocation4 + $0x18] sm:$0xff] }
  0x28   :  { %v76_v5 = vld [vmem:[#allocation4 + $0x20] sm:$0xff]  ;;  %v77_v6 = vld [vmem:[#allocation4 + $0x28] sm:$0xff]  ;;  %v88_v7 = vmul.f32 0.5, %v72_v1  ;;  %v89_v8 = vmul.f32 0.5, %v73_v2  ;;  %v90_v9 = vmul.f32 0.5, %v74_v3  ;;  %v78_v10 = vld [vmem:[#allocation4 + $0x30] sm:$0xff] }
  0x29   :  { %v91_v11 = vmul.f32 0.5, %v75_v4  ;;  %v79_v12 = vld [vmem:[#allocation4 + $0x38] sm:$0xff]  ;;  %v92_v13 = vmul.f32 0.5, %v76_v5  ;;  %v93_v14 = vmul.f32 0.5, %v77_v6  ;;  %v80_v15 = vld [vmem:[#allocation7] sm:$0xff]  ;;  %v81_v16 = vld [vmem:[#allocation7 + $0x8] sm:$0xff] }
  0x2a   :  { %244 = vtanh.f32 %v88_v7  ;;  %v82_v17 = vld [vmem:[#allocation7 + $0x10] sm:$0xff]  ;;  %v94_v18 = vmul.f32 0.5, %v78_v10  ;;  %v95_v19 = vmul.f32 0.5, %v79_v12  ;;  %v83_v20 = vld [vmem:[#allocation7 + $0x18] sm:$0xff]  ;;  %v84_v25 = vld [vmem:[#allocation7 + $0x20] sm:$0xff]  ;;  %s337_s16 = smov [#allocation9]  }
  0x2b   :  { %246 = vtanh.f32 %v89_v8  ;;  %v233_v21 = vld [vmem:[%s408_s3] ss:$0 sm:$0xff]  ;;  %v85_v28 = vld [vmem:[#allocation7 + $0x28] sm:$0xff]  ;;  %v86_v31 = vld [vmem:[#allocation7 + $0x30] sm:$0xff]  ;;  %s218_s17 = sshll.u32 %s337_s16, 4  ;;  %vm210_vm1 = vcmask 0   ;;  %s219_s17 = int_to_ptr.vmem [resolvable:$true] %s218_s17 }
  0x2c   :  { %248 = vtanh.f32 %v90_v9  ;;  %v142_v22 = vmul.f32 %v233_v21, %v80_v15  ;;  %v143_v23 = vmul.f32 %v233_v21, %v81_v16  ;;  %v144_v24 = vmul.f32 %v233_v21, %v82_v17  ;;  %v232_v39 = vld [vmem:[%s407_s2] ss:$0 sm:$0xff]  ;;  %s304_s20 = scalar_lea.vmem %s219_s17, 16  ;;  %s308_s21 = scalar_lea.vmem %s219_s17, 32 }
  0x2d   :  { %250 = vtanh.f32 %v91_v11  ;;  %v145_v26 = vmul.f32 %v233_v21, %v83_v20  ;;  %v146_v29 = vmul.f32 %v233_v21, %v84_v25  ;;  %v147_v33 = vmul.f32 %v233_v21, %v85_v28  ;;  %v87_v40 = vld [vmem:[#allocation7 + $0x38] sm:$0xff]  ;;  %p305_p2 = scmp.ne.s32.totalorder %s219_s17, %s304_s20  ;;  %p309_p3 = scmp.lt.s32.totalorder %s219_s17, %s219_s17 }
  0x2e   :  { %252 = vtanh.f32 %v92_v13  ;;  %v167_v27 = vadd.f32 %v143_v23, %v142_v22  ;;  %v148_v41 = vmul.f32 %v233_v21, %v86_v31  ;;  %v149_v54 = vmul.f32 %v233_v21, %v87_v40  ;;  %v166_v22 = vld [vmem:[#allocation3] sm:$0x1]  ;;  %p310_p4 = scmp.lt.s32.totalorder %s308_s21, %s304_s20 }
  0x2f   :  { %254 = vtanh.f32 %v93_v14 }
  0x30   :  { %256 = vtanh.f32 %v94_v18  ;;  %v168_v30 = vadd.f32 %v167_v27, %v144_v24  ;;  %p311_p5 = por %p310_p4, %p309_p3 }
  0x31   :  { %258 = vtanh.f32 %v95_v19 }
  0x32   :  { %v169_v34 = vadd.f32 %v168_v30, %v145_v26  ;;  %v150_v30 = vld [vmem:[#allocation2] sm:$0x1]  ;;  %p312_p6 = pnand %p311_p5, %p305_p2 }
  0x34   :  { %v245_v32 = vpop.eup %244  ;;  %v170_v42 = vadd.f32 %v169_v34, %v146_v29 }
  0x35   :  { %v247_v35 = vpop.eup %246  ;;  %v104_v36 = vadd.f32 1.0, %v245_v32 }
  0x36   :  { %v249_v37 = vpop.eup %248  ;;  %v105_v38 = vadd.f32 1.0, %v247_v35  ;;  %v171_v49 = vadd.f32 %v170_v42, %v147_v33 }
  0x37   :  { %v251_v43 = vpop.eup %250  ;;  %v106_v44 = vadd.f32 1.0, %v249_v37  ;;  %v112_v45 = vmul.f32 0.5, %v104_v36 }
  0x38   :  { %v253_v46 = vpop.eup %252  ;;  %v107_v47 = vadd.f32 1.0, %v251_v43  ;;  %v113_v48 = vmul.f32 0.5, %v105_v38  ;;  %v172_v59 = vadd.f32 %v171_v49, %v148_v41 }
  0x39   :  { %v255_v50 = vpop.eup %254  ;;  %v108_v51 = vadd.f32 1.0, %v253_v46  ;;  %v114_v52 = vmul.f32 0.5, %v106_v44  ;;  %v127_v53 = vmul.f32 %v232_v39, %v112_v45 }
  0x3a   :  { %v257_v55 = vpop.eup %256  ;;  %v109_v56 = vadd.f32 1.0, %v255_v50  ;;  %v115_v57 = vmul.f32 0.5, %v107_v47  ;;  %v128_v58 = vmul.f32 %v232_v39, %v113_v48  ;;  %v173_v4 = vadd.f32 %v172_v59, %v149_v54 }
  0x3b   :  { %v259_v60 = vpop.eup %258  ;;  %v110_v61 = vadd.f32 1.0, %v257_v55  ;;  %v116_v62 = vmul.f32 0.5, %v108_v51  ;;  %v129_v63 = vmul.f32 %v232_v39, %v114_v52 }
  0x3c   :  { %v111_v0 = vadd.f32 1.0, %v259_v60  ;;  %v117_v1 = vmul.f32 0.5, %v109_v56  ;;  %v130_v2 = vmul.f32 %v232_v39, %v115_v57  ;;  %v151_v3 = vadd.f32 %v128_v58, %v127_v53 }
  0x3d   :  { %v118_v5 = vmul.f32 0.5, %v110_v61  ;;  %v131_v6 = vmul.f32 %v232_v39, %v116_v62  ;;  %v174_v8 = vrot.slane %v173_v4, 4 }
  0x3e   :  { %v152_v7 = vadd.f32 %v151_v3, %v129_v63  ;;  %v119_v9 = vmul.f32 0.5, %v111_v0  ;;  %v132_v10 = vmul.f32 %v232_v39, %v117_v1 }
  0x3f   :  { %v175_v12 = vadd.f32 %v174_v8, %v173_v4  ;;  %v133_v13 = vmul.f32 %v232_v39, %v118_v5 }
  0x40   :  { %v153_v11 = vadd.f32 %v152_v7, %v130_v2  ;;  %v134_v16 = vmul.f32 %v232_v39, %v119_v9 }
  0x41   :  { %v176_v15 = vrot.slane %v175_v12, 2 }
  0x42   :  { %v154_v14 = vadd.f32 %v153_v11, %v131_v6 }
  0x43   :  { %v177_v18 = vadd.f32 %v176_v15, %v175_v12 }
  0x44   :  { %v155_v17 = vadd.f32 %v154_v14, %v132_v10 }
  0x45   :  { %v178_v20 = vrot.slane %v177_v18, 1 }
  0x46   :  { %v156_v19 = vadd.f32 %v155_v17, %v133_v13 }
  0x47   :  { %v179_v23 = vadd.f32 %v178_v20, %v177_v18 }
  0x48   :  { %v157_v21 = vadd.f32 %v156_v19, %v134_v16 }
  0x49   :  { %v180_v25 = vadd.f32 %v179_v23, %v166_v22 }
  0x4a   :  { %v158_v24 = vrot.slane %v157_v21, 4 }
  0x4b   :  { %181 = vst [vmem:[#allocation3] sm:$0x1] %v180_v25 }
  0x4c   :  { %v159_v26 = vadd.f32 %v158_v24, %v157_v21 }
  0x4e   :  { %v160_v27 = vrot.slane %v159_v26, 2 }
  0x50   :  { %v161_v28 = vadd.f32 %v160_v27, %v159_v26 }
  0x52   :  { %v162_v29 = vrot.slane %v161_v28, 1  ;;  %v197_v34 = vld [vmem:[#allocation3] sm:$0x1] }
  0x53   :  { %v198_v36 = vsel %vm186_vm0, %v197_v34, 0.0 }
  0x54   :  { %v163_v31 = vadd.f32 %v162_v29, %v161_v28 }
  0x56   :  { %v164_v32 = vadd.f32 %v163_v31, %v150_v30 }
  0x58   :  { %165 = vst [vmem:[#allocation2] sm:$0x1] %v164_v32 }
  0x5f   :  { %v185_v33 = vld [vmem:[#allocation2] sm:$0x1] }
  0x60   :  { %v187_v35 = vsel %vm186_vm0, %v185_v33, 0.0 }
  0x61   :  { %188 = vadd.xlane.f32.xlu0 %v187_v35 }
  0x65   :  { %199 = vadd.xlane.f32.xlu0 %v198_v36 }
  0xee   :  { %v189_v37 = vpop.xlane.xlu0 %188 }
  0xef   :  { %v190_v38 = vrot.slane %v189_v37, 4 }
  0xf1   :  { %v191_v39 = vadd.f32 %v190_v38, %v189_v37 }
  0xf2   :  { %v200_v40 = vpop.xlane.xlu0 %199 }
  0xf3   :  { %v192_v41 = vrot.slane %v191_v39, 2  ;;  %v201_v42 = vrot.slane %v200_v40, 4 }
  0xf5   :  { %v202_v43 = vadd.f32 %v201_v42, %v200_v40  ;;  %v193_v44 = vadd.f32 %v192_v41, %v191_v39 }
  0xf7   :  { %v203_v45 = vrot.slane %v202_v43, 2  ;;  %v194_v46 = vrot.slane %v193_v44, 1 }
  0xf9   :  { %v204_v47 = vadd.f32 %v203_v45, %v202_v43  ;;  %v195_v48 = vadd.f32 %v194_v46, %v193_v44 }
  0xfb   :  { %234 = vpush %v195_v48  ;;  %v205_v49 = vrot.slane %v204_v47, 1 }
  0xfd   :  { %v206_v50 = vadd.f32 %v205_v49, %v204_v47 }
  0xff   :  { %236 = vpush %v206_v50 }
 0x12c   :  { %s235_s2 = spop %234 }
 0x130   :  { %s237_s18 = spop %236 }
 0x131   :  { %s208_s19 = sadd.f32 %s237_s18, %s235_s2 }
 0x133   :  { %v209_v51 = vstv %s208_s19 }
 0x134   :  { %211 = vst.msk [vmem:[#allocation9] sm:$0x1] %vm210_vm1, %v209_v51 }
 0x135   :  { %315 = shalt.err (!%p312_p6)
}
 0x136   :  { %s316_s24 = scalar_lea.hbm %s409_s4, 16 }
 0x137   :  { %p317_p7 = scmp.ne.s32.totalorder %s409_s4, %s316_s24  ;;  %p320_p8 = scmp.lt.u32.totalorder %s316_s24, %s409_s4 }
 0x139   :  { %p322_p9 = pnand %p320_p8, %p317_p7 }
 0x13b   :  { %325 = shalt.err (!%p322_p9)
}
 0x13c   :  { %221 = dma.vmem_to_hbm [thread:$0]  %s219_s17, 16, %s409_s4, [#allocation6]  }
 0x13d   :  { %330 = dma.done.wait [#allocation6], 16  }
 0x13e   :  { %331 = vsyncadd [#allocation6], 4294967280 }
 0x13f   :  { %225 = vsyncpa [#allocation5], 1 }
 0x140   :  { %226 = vsyncpa [#allocation8], 1 }
 0x141   :  { %227 = vsyncpa [#allocation6], 1 }

</bundles_post_ra>
